<compile_context>
chip_gen: v7x
topology: tpu7x:2x2x1
jax: 0.10.0
libtpu: 0.0.40
codegen_flags: <defaults>
</compile_context>

<pallas_src>
import functools
import math

import jax
import jax.numpy as jnp
from jax.experimental import pallas as pl
from jax.experimental.pallas import tpu as pltpu

BN_EPS = 1e-5
_INV_SQRT2 = 1.0 / math.sqrt(2.0)
_GELU_TANH_C = math.sqrt(2.0 / math.pi)


def _round_up(n, m):
    return ((n + m - 1) // m) * m


def _cdiv(a, b):
    return -(-a // b)


def _gelu(x, approximate):
    if approximate:
        # tanh form: transcendental goes to the EUP slot (frees the 4 VALU slots).
        return 0.5 * x * (1.0 + jnp.tanh(_GELU_TANH_C * (x + 0.044715 * (x * x * x))))
    # exact erf form (nn.GELU default)
    return 0.5 * x * (1.0 + jax.lax.erf(x * _INV_SQRT2))


# ----------------------------------------------------------------------------- kernel
def _mlp_kernel(x_ref, w1_ref, b1_ref, w2_ref, b2_ref, w3_ref, b3_ref, o_ref, *,
                approx_gelu):
    # x arrives f32 (no wrapper-side cast pass over HBM); cast to bf16 on the VPU.
    x = x_ref[...].astype(jnp.bfloat16)

    # Layer 1: Linear -> Dropout(identity, eval) -> GELU      (BN1 folded into W2/b2)
    h = jnp.dot(x, w1_ref[...], preferred_element_type=jnp.float32) + b1_ref[...]
    h = _gelu(h, approx_gelu)

    # Layer 2: Linear (BN1 pre-folded) -> Dropout(identity) -> GELU (BN2 folded into w3/b3)
    h = jnp.dot(h.astype(jnp.bfloat16), w2_ref[...],
                preferred_element_type=jnp.float32) + b2_ref[...]
    h = _gelu(h, approx_gelu)

    # Layer 3: Linear(E, 1) + Tanh.  Single output column -> VPU multiply + XLU lane
    # reduce (no N=1 MXU matmul); writeback per tile is a tiny (tm, 1) column.
    logits = jnp.sum(h * w3_ref[...], axis=-1, keepdims=True) + b3_ref[0, 0]
    o_ref[...] = jnp.tanh(logits).astype(o_ref.dtype)


# ----------------------------------------------------------------------------- host side
def _prepare_params(params):
    """Fold eval-mode BatchNorm1d into the following Linear (exact) and zero-pad the
    embedding dim to a multiple of 128 (exact: padded lanes stay identically zero)."""
    s1 = params["g1"] * jax.lax.rsqrt(params["v1"] + BN_EPS)      # (1, E)
    t1 = params["be1"] - params["m1"] * s1
    w2f = params["w2"] * s1.reshape(-1, 1)                        # scale rows of W2
    b2f = params["b2"] + t1 @ params["w2"]

    s2 = params["g2"] * jax.lax.rsqrt(params["v2"] + BN_EPS)
    t2 = params["be2"] - params["m2"] * s2
    w3f = (params["w3"] * s2.reshape(-1, 1)).reshape(1, -1)       # (1, E)
    b3f = (params["b3"] + t2 @ params["w3"]).reshape(1, 1)        # (1, 1)

    e = params["w1"].shape[1]
    e_pad = _round_up(e, 128)
    pe = e_pad - e

    w1 = jnp.pad(params["w1"], ((0, 0), (0, pe)))
    b1 = jnp.pad(params["b1"], ((0, 0), (0, pe)))
    w2 = jnp.pad(w2f, ((0, pe), (0, pe)))
    b2 = jnp.pad(b2f, ((0, 0), (0, pe)))
    w3 = jnp.pad(w3f, ((0, 0), (0, pe)))

    return dict(
        w1=w1.astype(jnp.bfloat16), b1=b1.astype(jnp.float32),
        w2=w2.astype(jnp.bfloat16), b2=b2.astype(jnp.float32),
        w3=w3.astype(jnp.float32), b3=b3f.astype(jnp.float32),
    ), e_pad


def _auto_tile_m(e_pad, input_dim):
    """Pick a batch tile that keeps the double-buffered x tile plus ~4 live f32 (tm, E_pad)
    intermediates well inside v7x's 64 MiB VMEM (and v5e's small scoped default)."""
    per_row = 2 * 4 * input_dim + 4 * 4 * e_pad
    tm = (24 << 20) // max(per_row, 1)
    return int(max(256, min(2048, (tm // 128) * 128)))


def mlp_forward(x, params, *, tile_m=None, approx_gelu=True):
    """x: (batch, input_dim) float32. Returns (batch, 1) float32 (eval-mode forward)."""
    batch, input_dim = x.shape
    p, e_pad = _prepare_params(params)

    if tile_m is None:
        tile_m = _auto_tile_m(e_pad, input_dim)

    # Pad batch only to a lane multiple (128); tiles are equalized so the extra
    # padding is < 128 rows per tile (not a full-tile round-up).
    padded128 = _round_up(batch, 128)
    num_tiles = max(1, _cdiv(padded128, tile_m))
    if num_tiles == 1 and padded128 >= 256:
        num_tiles = 2          # let the "parallel" batch axis split across v7x's 2 TCs
    tm = _round_up(_cdiv(padded128, num_tiles), 128)
    padded = tm * num_tiles

    # x stays float32 here; bf16 cast happens inside the kernel (one fewer HBM pass).
    x_p = x if padded == batch else jnp.pad(x, ((0, padded - batch), (0, 0)))

    vmem_estimate = (
        2 * tm * input_dim * 4                  # double-buffered x tile (f32)
        + 2 * (input_dim + e_pad) * e_pad * 2   # double-buffered W1 / W2 (bf16)
        + 4 * tm * e_pad * 4                    # live f32/bf16 intermediates (generous)
        + 2 * tm * 4                            # output blocks
        + 8 * e_pad * 4                         # biases / w3
    )
    vmem_limit = int(min(64 << 20, max(32 << 20, 1.5 * vmem_estimate)))

    const = lambda i: (0, 0)   # weights / biases stay VMEM-resident across grid steps
    kernel = functools.partial(_mlp_kernel, approx_gelu=approx_gelu)

    out = pl.pallas_call(
        kernel,
        out_shape=jax.ShapeDtypeStruct((padded, 1), jnp.float32),
        grid=(num_tiles,),
        in_specs=[
            pl.BlockSpec((tm, input_dim), lambda i: (i, 0)),      # x tile (f32)
            pl.BlockSpec((input_dim, e_pad), const),              # W1 (bf16)
            pl.BlockSpec((1, e_pad), const),                      # b1
            pl.BlockSpec((e_pad, e_pad), const),                  # W2 (BN1 folded, bf16)
            pl.BlockSpec((1, e_pad), const),                      # b2 (BN1 folded)
            pl.BlockSpec((1, e_pad), const),                      # w3 row (BN2 folded)
            pl.BlockSpec(memory_space=pltpu.MemorySpace.SMEM),    # b3 scalar
        ],
        out_specs=pl.BlockSpec((tm, 1), lambda i: (i, 0)),
        compiler_params=pltpu.CompilerParams(
            dimension_semantics=("parallel",),
            vmem_limit_bytes=vmem_limit,
        ),
    )(x_p, p["w1"], p["b1"], p["w2"], p["b2"], p["w3"], p["b3"])

    return out[:batch]


# ----------------------------------------------------------------------------- reference & init
def mlp_reference(x, params):
    """Pure-JAX eval-mode reference (matches the PyTorch module in eval())."""
    h = x @ params["w1"] + params["b1"]
    h = _gelu(h, approximate=False)
    h = (h - params["m1"]) * jax.lax.rsqrt(params["v1"] + BN_EPS) * params["g1"] + params["be1"]
    h = h @ params["w2"] + params["b2"]
    h = _gelu(h, approximate=False)
    h = (h - params["m2"]) * jax.lax.rsqrt(params["v2"] + BN_EPS) * params["g2"] + params["be2"]
    return jnp.tanh(h @ params["w3"] + params["b3"])


def init_params(key, input_dim, embedding_dim):
    """Deterministic init mirroring the PyTorch module's parameter shapes."""
    ks = jax.random.split(key, 6)

    def linear(kw, kb, fan_in, fan_out):
        bound = 1.0 / math.sqrt(fan_in)
        w = jax.random.uniform(kw, (fan_in, fan_out), jnp.float32, -bound, bound)
        b = jax.random.uniform(kb, (1, fan_out), jnp.float32, -bound, bound)
        return w, b

    w1, b1 = linear(ks[0], ks[1], input_dim, embedding_dim)
    w2, b2 = linear(ks[2], ks[3], embedding_dim, embedding_dim)
    w3, b3 = linear(ks[4], ks[5], embedding_dim, 1)

    e = embedding_dim
    return {
        "w1": w1, "b1": b1,
        "g1": jnp.ones((1, e), jnp.float32), "be1": jnp.zeros((1, e), jnp.float32),
        "m1": jnp.zeros((1, e), jnp.float32), "v1": jnp.ones((1, e), jnp.float32),
        "w2": w2, "b2": b2,
        "g2": jnp.ones((1, e), jnp.float32), "be2": jnp.zeros((1, e), jnp.float32),
        "m2": jnp.zeros((1, e), jnp.float32), "v2": jnp.ones((1, e), jnp.float32),
        "w3": w3, "b3": b3,
    }


if __name__ == "__main__":
    # TODO(synk): Dropout(0.5) in training mode and BatchNorm1d batch-statistics
    # (training mode) are not implemented; this matches the module's eval() forward.
    key = jax.random.PRNGKey(0)
    k_x, k_p = jax.random.split(key)

    batch, input_dim, embedding_dim = 8, 16, 32
    x = jax.random.normal(k_x, (batch, input_dim), jnp.float32)
    params = init_params(k_p, input_dim, embedding_dim)

    ref = mlp_reference(x, params)

    out = mlp_forward(x, params)                       # default: tanh-approx GELU
    jax.block_until_ready(out)
    assert out.shape == (batch, 1)
    assert out.dtype == jnp.float32
    assert jnp.allclose(out, ref, atol=5e-2), float(jnp.max(jnp.abs(out - ref)))

    out_exact = mlp_forward(x, params, approx_gelu=False)   # exact-erf GELU path
    jax.block_until_ready(out_exact)
    assert jnp.allclose(out_exact, ref, atol=5e-2), float(jnp.max(jnp.abs(out_exact - ref)))

    print("KERNEL_OK")
</pallas_src>

<mosaic_0001>
module attributes {stable_mosaic.version = 11 : i64} {
  func.func @_mlp_kernel(%arg0: i32, %arg1: memref<128x16xf32, #tpu.memory_space<vmem>>, %arg2: memref<16x128xbf16, #tpu.memory_space<vmem>>, %arg3: memref<1x128xf32, #tpu.memory_space<vmem>>, %arg4: memref<128x128xbf16, #tpu.memory_space<vmem>>, %arg5: memref<1x128xf32, #tpu.memory_space<vmem>>, %arg6: memref<1x128xf32, #tpu.memory_space<vmem>>, %arg7: memref<1x1xf32, #tpu.memory_space<smem>>, %arg8: memref<128x1xf32, #tpu.memory_space<vmem>>) attributes {dimension_semantics = [#tpu.dimension_semantics<parallel>], iteration_bounds = array<i64: 1>, scalar_prefetch = 0 : i64, scratch_operands = 0 : i64, tpu.core_type = #tpu.core_type<tc>, window_params = [{transform_indices = @transform_0, window_bounds = array<i64: 128, 16>}, {pipeline_mode = #tpu.pipeline_mode<synchronous>, transform_indices = @transform_1, window_bounds = array<i64: 16, 128>}, {pipeline_mode = #tpu.pipeline_mode<synchronous>, transform_indices = @transform_2, window_bounds = array<i64: 1, 128>}, {pipeline_mode = #tpu.pipeline_mode<synchronous>, transform_indices = @transform_3, window_bounds = array<i64: 128, 128>}, {pipeline_mode = #tpu.pipeline_mode<synchronous>, transform_indices = @transform_4, window_bounds = array<i64: 1, 128>}, {pipeline_mode = #tpu.pipeline_mode<synchronous>, transform_indices = @transform_5, window_bounds = array<i64: 1, 128>}, {transform_indices = @transform_6, window_bounds = array<i64: 1, 1>}, {transform_indices = @transform_7, window_bounds = array<i64: 128, 1>}]} {
    %c0 = arith.constant 0 : index
    %c0_0 = arith.constant 0 : index
    %0 = vector.load %arg1[%c0, %c0_0] : memref<128x16xf32, #tpu.memory_space<vmem>>, vector<128x16xf32>
    %1 = arith.truncf %0 : vector<128x16xf32> to vector<128x16xbf16>
    %c0_1 = arith.constant 0 : index
    %c0_2 = arith.constant 0 : index
    %2 = vector.load %arg2[%c0_1, %c0_2] : memref<16x128xbf16, #tpu.memory_space<vmem>>, vector<16x128xbf16>
    %cst = arith.constant dense<0.000000e+00> : vector<128x128xf32>
    %3 = tpu.matmul %1, %2, %cst {dimension_numbers = #tpu.dot_dimension_numbers<[1], [0], [0], [1], [0, 0, 1, 1], [], []>} : vector<128x16xbf16>, vector<16x128xbf16>, vector<128x128xf32> -> vector<128x128xf32>
    %c0_3 = arith.constant 0 : index
    %c0_4 = arith.constant 0 : index
    %4 = vector.load %arg3[%c0_3, %c0_4] : memref<1x128xf32, #tpu.memory_space<vmem>>, vector<1x128xf32>
    %5 = vector.broadcast %4 : vector<1x128xf32> to vector<128x128xf32>
    %6 = arith.addf %3, %5 : vector<128x128xf32>
    %cst_5 = arith.constant 5.000000e-01 : f32
    %7 = vector.broadcast %cst_5 : f32 to vector<128x128xf32>
    %8 = arith.mulf %7, %6 : vector<128x128xf32>
    %9 = arith.mulf %6, %6 : vector<128x128xf32>
    %10 = arith.mulf %9, %6 : vector<128x128xf32>
    %cst_6 = arith.constant 4.471500e-02 : f32
    %11 = vector.broadcast %cst_6 : f32 to vector<128x128xf32>
    %12 = arith.mulf %11, %10 : vector<128x128xf32>
    %13 = arith.addf %6, %12 : vector<128x128xf32>
    %cst_7 = arith.constant 0.797884583 : f32
    %14 = vector.broadcast %cst_7 : f32 to vector<128x128xf32>
    %15 = arith.mulf %14, %13 : vector<128x128xf32>
    %16 = math.tanh %15 : vector<128x128xf32>
    %cst_8 = arith.constant 1.000000e+00 : f32
    %17 = vector.broadcast %cst_8 : f32 to vector<128x128xf32>
    %18 = arith.addf %17, %16 : vector<128x128xf32>
    %19 = arith.mulf %8, %18 : vector<128x128xf32>
    %20 = arith.truncf %19 : vector<128x128xf32> to vector<128x128xbf16>
    %c0_9 = arith.constant 0 : index
    %c0_10 = arith.constant 0 : index
    %21 = vector.load %arg4[%c0_9, %c0_10] : memref<128x128xbf16, #tpu.memory_space<vmem>>, vector<128x128xbf16>
    %cst_11 = arith.constant dense<0.000000e+00> : vector<128x128xf32>
    %22 = tpu.matmul %20, %21, %cst_11 {dimension_numbers = #tpu.dot_dimension_numbers<[1], [0], [0], [1], [0, 0, 1, 1], [], []>} : vector<128x128xbf16>, vector<128x128xbf16>, vector<128x128xf32> -> vector<128x128xf32>
    %c0_12 = arith.constant 0 : index
    %c0_13 = arith.constant 0 : index
    %23 = vector.load %arg5[%c0_12, %c0_13] : memref<1x128xf32, #tpu.memory_space<vmem>>, vector<1x128xf32>
    %24 = vector.broadcast %23 : vector<1x128xf32> to vector<128x128xf32>
    %25 = arith.addf %22, %24 : vector<128x128xf32>
    %cst_14 = arith.constant 5.000000e-01 : f32
    %26 = vector.broadcast %cst_14 : f32 to vector<128x128xf32>
    %27 = arith.mulf %26, %25 : vector<128x128xf32>
    %28 = arith.mulf %25, %25 : vector<128x128xf32>
    %29 = arith.mulf %28, %25 : vector<128x128xf32>
    %cst_15 = arith.constant 4.471500e-02 : f32
    %30 = vector.broadcast %cst_15 : f32 to vector<128x128xf32>
    %31 = arith.mulf %30, %29 : vector<128x128xf32>
    %32 = arith.addf %25, %31 : vector<128x128xf32>
    %cst_16 = arith.constant 0.797884583 : f32
    %33 = vector.broadcast %cst_16 : f32 to vector<128x128xf32>
    %34 = arith.mulf %33, %32 : vector<128x128xf32>
    %35 = math.tanh %34 : vector<128x128xf32>
    %cst_17 = arith.constant 1.000000e+00 : f32
    %36 = vector.broadcast %cst_17 : f32 to vector<128x128xf32>
    %37 = arith.addf %36, %35 : vector<128x128xf32>
    %38 = arith.mulf %27, %37 : vector<128x128xf32>
    %c0_18 = arith.constant 0 : index
    %c0_19 = arith.constant 0 : index
    %39 = vector.load %arg6[%c0_18, %c0_19] : memref<1x128xf32, #tpu.memory_space<vmem>>, vector<1x128xf32>
    %40 = vector.broadcast %39 : vector<1x128xf32> to vector<128x128xf32>
    %41 = arith.mulf %38, %40 : vector<128x128xf32>
    %cst_20 = arith.constant dense<0.000000e+00> : vector<128xf32>
    %42 = vector.multi_reduction <add>, %41, %cst_20 [1] : vector<128x128xf32> to vector<128xf32>
    %43 = vector.shape_cast %42 : vector<128xf32> to vector<128x1xf32>
    %c0_21 = arith.constant 0 : index
    %c0_22 = arith.constant 0 : index
    %44 = memref.load %arg7[%c0_21, %c0_22] : memref<1x1xf32, #tpu.memory_space<smem>>
    %45 = vector.broadcast %44 : f32 to vector<128x1xf32>
    %46 = arith.addf %43, %45 : vector<128x1xf32>
    %47 = math.tanh %46 : vector<128x1xf32>
    %c0_23 = arith.constant 0 : index
    %c0_24 = arith.constant 0 : index
    %48 = vector.load %arg8[%c0_23, %c0_24] : memref<128x1xf32, #tpu.memory_space<vmem>>, vector<128x1xf32>
    tpu.vector_store %arg8[%c0_23, %c0_24], %47 {strides = array<i32>} : memref<128x1xf32, #tpu.memory_space<vmem>>, vector<128x1xf32>,
    return
  }
  func.func @transform_0(%arg0: i32) -> (i32, i32) {
    %c0_i32 = arith.constant 0 : i32
    %c0_i32_0 = arith.constant 0 : i32
    return %arg0, %c0_i32 : i32, i32
  }
  func.func @transform_1(%arg0: i32) -> (i32, i32) {
    %c0_i32 = arith.constant 0 : i32
    %c0_i32_0 = arith.constant 0 : i32
    %c0_i32_1 = arith.constant 0 : i32
    return %c0_i32, %c0_i32_0 : i32, i32
  }
  func.func @transform_2(%arg0: i32) -> (i32, i32) {
    %c0_i32 = arith.constant 0 : i32
    %c0_i32_0 = arith.constant 0 : i32
    %c0_i32_1 = arith.constant 0 : i32
    return %c0_i32, %c0_i32_0 : i32, i32
  }
  func.func @transform_3(%arg0: i32) -> (i32, i32) {
    %c0_i32 = arith.constant 0 : i32
    %c0_i32_0 = arith.constant 0 : i32
    %c0_i32_1 = arith.constant 0 : i32
    return %c0_i32, %c0_i32_0 : i32, i32
  }
  func.func @transform_4(%arg0: i32) -> (i32, i32) {
    %c0_i32 = arith.constant 0 : i32
    %c0_i32_0 = arith.constant 0 : i32
    %c0_i32_1 = arith.constant 0 : i32
    return %c0_i32, %c0_i32_0 : i32, i32
  }
  func.func @transform_5(%arg0: i32) -> (i32, i32) {
    %c0_i32 = arith.constant 0 : i32
    %c0_i32_0 = arith.constant 0 : i32
    %c0_i32_1 = arith.constant 0 : i32
    return %c0_i32, %c0_i32_0 : i32, i32
  }
  func.func @transform_6(%arg0: i32) -> (i32, i32) {
    %c0_i32 = arith.constant 0 : i32
    %c0_i32_0 = arith.constant 0 : i32
    %c0_i32_1 = arith.constant 0 : i32
    return %c0_i32, %c0_i32_0 : i32, i32
  }
  func.func @transform_7(%arg0: i32) -> (i32, i32) {
    %c0_i32 = arith.constant 0 : i32
    %c0_i32_0 = arith.constant 0 : i32
    return %arg0, %c0_i32 : i32, i32
  }
}

</mosaic_0001>

<bundles_post_ra>
// kernel: tpu_custom_call.1
= control target key start
LH: loop header
LB: loop body
LE: loop exit
PB: predicated region body
PF: predicated region fallthrough
CT: control target
= control target key end

     0   :  { %vm67_vm0 = vcmask 130048   ;;  %vm742_vm1 = vcmask 7168   ;;  %s1448_s1 = inlined_call_operand.vmem [shape: bf16[16,128], index: 1, kind: input, shape index: {}]   ;;  %s1449_s0 = inlined_call_operand.vmem [shape: f32[128,16], index: 0, kind: input, shape index: {}]   ;;  %s1450_s3 = inlined_call_operand.vmem [shape: bf16[128,128], index: 3, kind: input, shape index: {}]   ;;  %s1451_s2 = inlined_call_operand.vmem [shape: f32[1,128], index: 2, kind: input, shape index: {}]   ;;  %s1452_s4 = inlined_call_operand.vmem [shape: f32[1,128], index: 4, kind: input, shape index: {}]   ;;  %s1453_s5 = inlined_call_operand.vmem [shape: f32[1,128], index: 5, kind: input, shape index: {}]   ;;  %s1454_s6 = inlined_call_operand.<no memory space> [shape: f32[1,1], index: 6, kind: input, shape index: {}]   ;;  %s1455_s7 = inlined_call_operand.vmem [shape: f32[128,1], index: 7, kind: output, shape index: {}]  }
   0x1   :  { %v874_v0 = vld [vmem:[%s1448_s1] sm:$0xff]   ;;  %v29_v2 = vld [vmem:[%s1449_s0 + $0x8] sm:$0xff]  ;;  %v30_v3 = vld [vmem:[%s1449_s0 + $0x10] sm:$0xff] }
   0x2   :  { %v28_v1 = vld [vmem:[%s1449_s0] sm:$0xff]  ;;  %808 = vmatprep.subr.bf16.mxu0 %v874_v0  ;;  %v31_v5 = vld [vmem:[%s1449_s0 + $0x18] sm:$0xff]  ;;  %v33_v7 = vld [vmem:[%s1449_s0 + $0x28] sm:$0xff] }
   0x3   :  { %v44_v4 = vpack.c.bf16 %v29_v2, %v28_v1  ;;  %v32_v6 = vld [vmem:[%s1449_s0 + $0x20] sm:$0xff]  ;;  %809 = vmatpush3.bf16.msra.mxu0 %v874_v0  ;;  %v45_v8 = vpack.c.bf16 %v31_v5, %v30_v3  ;;  %v34_v10 = vld [vmem:[%s1449_s0 + $0x30] sm:$0xff]  ;;  %v35_v11 = vld [vmem:[%s1449_s0 + $0x38] sm:$0xff] }
   0x4   :  { %v46_v9 = vpack.c.bf16 %v33_v7, %v32_v6  ;;  %v36_v12 = vld [vmem:[%s1449_s0 + $0x40] sm:$0xff]  ;;  %v37_v13 = vld [vmem:[%s1449_s0 + $0x48] sm:$0xff]  ;;  %v47_v14 = vpack.c.bf16 %v35_v11, %v34_v10  ;;  %v38_v16 = vld [vmem:[%s1449_s0 + $0x50] sm:$0xff] }
   0x5   :  { %810 = vmatprep.mubr.msk.bf16.mxu0 %vm67_vm0, %v44_v4  ;;  %v48_v15 = vpack.c.bf16 %v37_v13, %v36_v12  ;;  %v39_v17 = vld [vmem:[%s1449_s0 + $0x58] sm:$0xff]  ;;  %v40_v18 = vld [vmem:[%s1449_s0 + $0x60] sm:$0xff]  ;;  %v41_v19 = vld [vmem:[%s1449_s0 + $0x68] sm:$0xff] }
   0x6   :  { %811 = vmatmul.mubr.msk.bf16.vlgmr.msra.gmra.mrb[0].mxu0 %vm67_vm0, %v45_v8  ;;  %v49_v20 = vpack.c.bf16 %v39_v17, %v38_v16  ;;  %v50_v21 = vpack.c.bf16 %v41_v19, %v40_v18  ;;  %v42_v22 = vld [vmem:[%s1449_s0 + $0x70] sm:$0xff]  ;;  %v43_v23 = vld [vmem:[%s1449_s0 + $0x78] sm:$0xff]  ;;  %v875_v25 = vld [vmem:[%s1450_s3] sm:$0xff]  }
   0x7   :  { %814 = vmatprep.mubr.msk.bf16.mxu0 %vm67_vm0, %v46_v9  ;;  %v51_v24 = vpack.c.bf16 %v43_v23, %v42_v22  ;;  %826 = vmatprep.subr.bf16.mxu0 %v875_v25  ;;  %v876_v26 = vld [vmem:[%s1450_s3 + $0x8] sm:$0xff]   ;;  %v877_v27 = vld [vmem:[%s1450_s3 + $0x10] sm:$0xff]   ;;  %v878_v28 = vld [vmem:[%s1450_s3 + $0x18] sm:$0xff]  }
   0x8   :  { %858 = vmatprep.subr.bf16.mxu1 %v875_v25  ;;  %827 = vmatpush3.bf16.msra.mxu0 %v875_v25  ;;  %v879_v29 = vld [vmem:[%s1450_s3 + $0x20] sm:$0xff]   ;;  %v880_v30 = vld [vmem:[%s1450_s3 + $0x28] sm:$0xff]   ;;  %v881_v31 = vld [vmem:[%s1450_s3 + $0x30] sm:$0xff]  }
   0x9   :  { %866 = vmatpush3.bf16.msra.mxu1 %v875_v25  ;;  %828 = vmatprep.subr.bf16.mxu0 %v876_v26  ;;  %v882_v32 = vld [vmem:[%s1450_s3 + $0x38] sm:$0xff]   ;;  %v1105_v33 = vld [vmem:[%s1451_s2] ss:$0 sm:$0xff] }
   0xa   :  { %859 = vmatprep.subr.bf16.mxu1 %v876_v26 }
   0xc   :  { %829 = vmatpush3.bf16.msra.mxu0 %v876_v26 }
   0xd   :  { %867 = vmatpush3.bf16.msra.mxu1 %v876_v26  ;;  %830 = vmatprep.subr.bf16.mxu0 %v877_v27 }
   0xe   :  { %815 = vmatmul.mubr.msk.bf16.gmra.mrb[4].mxu0 %vm67_vm0, %v47_v14  ;;  %860 = vmatprep.subr.bf16.mxu1 %v877_v27 }
   0xf   :  { %818 = vmatprep.mubr.msk.bf16.mxu0 %vm67_vm0, %v48_v15 }
  0x10   :  { %831 = vmatpush3.bf16.msra.mxu0 %v877_v27 }
  0x11   :  { %868 = vmatpush3.bf16.msra.mxu1 %v877_v27  ;;  %832 = vmatprep.subr.bf16.mxu0 %v878_v28 }
  0x12   :  { %861 = vmatprep.subr.bf16.mxu1 %v878_v28 }
  0x14   :  { %833 = vmatpush3.bf16.msra.mxu0 %v878_v28 }
  0x15   :  { %869 = vmatpush3.bf16.msra.mxu1 %v878_v28  ;;  %834 = vmatprep.subr.bf16.mxu0 %v879_v29 }
  0x16   :  { %819 = vmatmul.mubr.msk.bf16.gmra.mrb[8].mxu0 %vm67_vm0, %v49_v20  ;;  %862 = vmatprep.subr.bf16.mxu1 %v879_v29 }
  0x17   :  { %822 = vmatprep.mubr.msk.bf16.mxu0 %vm67_vm0, %v50_v21 }
  0x18   :  { %835 = vmatpush3.bf16.msra.mxu0 %v879_v29 }
  0x19   :  { %870 = vmatpush3.bf16.msra.mxu1 %v879_v29  ;;  %836 = vmatprep.subr.bf16.mxu0 %v880_v30 }
  0x1a   :  { %863 = vmatprep.subr.bf16.mxu1 %v880_v30 }
  0x1c   :  { %837 = vmatpush3.bf16.msra.mxu0 %v880_v30 }
  0x1d   :  { %871 = vmatpush3.bf16.msra.mxu1 %v880_v30  ;;  %838 = vmatprep.subr.bf16.mxu0 %v881_v31 }
  0x1e   :  { %823 = vmatmul.mubr.msk.bf16.gmra.mrb[12].mxu0 %vm67_vm0, %v51_v24  ;;  %864 = vmatprep.subr.bf16.mxu1 %v881_v31 }
  0x20   :  { %839 = vmatpush3.bf16.msra.mxu0 %v881_v31 }
  0x21   :  { %872 = vmatpush3.bf16.msra.mxu1 %v881_v31  ;;  %840 = vmatprep.subr.bf16.mxu0 %v882_v32 }
  0x22   :  { %865 = vmatprep.subr.bf16.mxu1 %v882_v32 }
  0x24   :  { %841 = vmatpush3.bf16.msra.mxu0 %v882_v32 }
  0x25   :  { %873 = vmatpush3.bf16.msra.mxu1 %v882_v32 }
  0xd9   :  { %v812_v34 = vpop.f32.mrb[0].mxu0 }
  0xda   :  { %v135_v35 = vadd.f32 %v812_v34, %v1105_v33  ;;  %v126_v36 = vpop.f32.mrb[1].mxu0 }
  0xdb   :  { %v127_v37 = vadd.f32 %v1105_v33, %v126_v36  ;;  %v813_v38 = vpop.f32.mrb[2].mxu0 }
  0xdc   :  { %v207_v39 = vmul.f32 %v135_v35, %v135_v35  ;;  %v138_v40 = vadd.f32 %v813_v38, %v1105_v33  ;;  %v129_v41 = vpop.f32.mrb[3].mxu0  ;;  %v1111_v53 = vmul.f32 0.5, %v135_v35 }
  0xdd   :  { %v205_v42 = vmul.f32 %v127_v37, %v127_v37  ;;  %v130_v43 = vadd.f32 %v1105_v33, %v129_v41  ;;  %v1117_v62 = vmul.f32 0.5, %v127_v37 }
  0xde   :  { %v223_v44 = vmul.f32 %v207_v39, %v135_v35  ;;  %v208_v45 = vmul.f32 %v138_v40, %v138_v40  ;;  %v1128_v14 = vmul.f32 0.5, %v138_v40 }
  0xdf   :  { %v221_v46 = vmul.f32 %v205_v42, %v127_v37  ;;  %v206_v47 = vmul.f32 %v130_v43, %v130_v43  ;;  %v1131_v20 = vmul.f32 0.5, %v130_v43 }
  0xe0   :  { %v239_v48 = vmul.f32 0.044715, %v223_v44  ;;  %v224_v49 = vmul.f32 %v208_v45, %v138_v40 }
  0xe1   :  { %v237_v50 = vmul.f32 0.044715, %v221_v46  ;;  %v222_v51 = vmul.f32 %v206_v47, %v130_v43  ;;  %v816_v52 = vpop.f32.mrb[4].mxu0 }
  0xe2   :  { %v255_v54 = vadd.f32 %v239_v48, %v135_v35  ;;  %v240_v55 = vmul.f32 0.044715, %v224_v49  ;;  %v1114_v56 = vadd.f32 %v816_v52, %v1105_v33  ;;  %v142_v57 = vpop.f32.mrb[5].mxu0 }
  0xe3   :  { %v253_v58 = vadd.f32 %v237_v50, %v127_v37  ;;  %v238_v59 = vmul.f32 0.044715, %v222_v51  ;;  %v143_v60 = vadd.f32 %v1105_v33, %v142_v57  ;;  %v817_v61 = vpop.f32.mrb[6].mxu0 }
  0xe4   :  { %v271_v63 = vmul.f32 0.7978846, %v255_v54  ;;  %v256_v0 = vadd.f32 %v240_v55, %v138_v40  ;;  %v211_v1 = vmul.f32 %v1114_v56, %v1114_v56  ;;  %v1122_v2 = vadd.f32 %v817_v61, %v1105_v33  ;;  %v145_v3 = vpop.f32.mrb[7].mxu0 }
  0xe5   :  { %v269_v4 = vmul.f32 0.7978846, %v253_v58  ;;  %v254_v5 = vadd.f32 %v238_v59, %v130_v43  ;;  %v209_v6 = vmul.f32 %v143_v60, %v143_v60  ;;  %v146_v7 = vadd.f32 %v1105_v33, %v145_v3 }
  0xe6   :  { %883 = vtanh.f32 %v271_v63  ;;  %v272_v8 = vmul.f32 0.7978846, %v256_v0  ;;  %v227_v9 = vmul.f32 %v211_v1, %v1114_v56  ;;  %v212_v10 = vmul.f32 %v1122_v2, %v1122_v2 }
  0xe7   :  { %885 = vtanh.f32 %v269_v4  ;;  %v270_v11 = vmul.f32 0.7978846, %v254_v5  ;;  %v225_v12 = vmul.f32 %v209_v6, %v143_v60  ;;  %v210_v13 = vmul.f32 %v146_v7, %v146_v7 }
  0xe8   :  { %887 = vtanh.f32 %v272_v8  ;;  %v243_v15 = vmul.f32 0.044715, %v227_v9  ;;  %v228_v16 = vmul.f32 %v212_v10, %v1122_v2  ;;  %v1133_v21 = vmul.f32 0.5, %v143_v60 }
  0xe9   :  { %v241_v17 = vmul.f32 0.044715, %v225_v12  ;;  %v226_v18 = vmul.f32 %v210_v13, %v146_v7  ;;  %v820_v19 = vpop.f32.mrb[8].mxu0  ;;  %889 = vtanh.f32 %v270_v11  ;;  %v1142_v29 = vmul.f32 0.5, %v146_v7 }
  0xea   :  { %v259_v22 = vadd.f32 %v243_v15, %v1114_v56  ;;  %v244_v23 = vmul.f32 0.044715, %v228_v16  ;;  %v1137_v24 = vadd.f32 %v820_v19, %v1105_v33  ;;  %v158_v25 = vpop.f32.mrb[9].mxu0  ;;  %v1163_v50 = vmul.f32 0.5, %v1114_v56 }
  0xeb   :  { %v242_v26 = vmul.f32 0.044715, %v226_v18  ;;  %v1140_v27 = vadd.f32 %v1105_v33, %v158_v25  ;;  %v821_v28 = vpop.f32.mrb[10].mxu0  ;;  %v257_v30 = vadd.f32 %v241_v17, %v143_v60 }
  0xec   :  { %v275_v31 = vmul.f32 0.7978846, %v259_v22  ;;  %v260_v32 = vadd.f32 %v244_v23, %v1122_v2  ;;  %v215_v34 = vmul.f32 %v1137_v24, %v1137_v24  ;;  %v1148_v35 = vadd.f32 %v821_v28, %v1105_v33  ;;  %v161_v36 = vpop.f32.mrb[11].mxu0 }
  0xed   :  { %v213_v37 = vmul.f32 %v1140_v27, %v1140_v27  ;;  %v1153_v38 = vadd.f32 %v1105_v33, %v161_v36  ;;  %v258_v39 = vadd.f32 %v242_v26, %v146_v7  ;;  %v273_v40 = vmul.f32 0.7978846, %v257_v30 }
  0xee   :  { %891 = vtanh.f32 %v275_v31  ;;  %v276_v41 = vmul.f32 0.7978846, %v260_v32  ;;  %v231_v42 = vmul.f32 %v215_v34, %v1137_v24  ;;  %v216_v43 = vmul.f32 %v1148_v35, %v1148_v35 }
  0xef   :  { %v229_v44 = vmul.f32 %v213_v37, %v1140_v27  ;;  %v214_v45 = vmul.f32 %v1153_v38, %v1153_v38  ;;  %v274_v46 = vmul.f32 0.7978846, %v258_v39  ;;  %893 = vtanh.f32 %v273_v40 }
  0xf0   :  { %v884_v47 = vpop.eup %883  ;;  %895 = vtanh.f32 %v276_v41  ;;  %v247_v48 = vmul.f32 0.044715, %v231_v42  ;;  %v232_v49 = vmul.f32 %v216_v43, %v1148_v35 }
  0xf1   :  { %v886_v51 = vpop.eup %885  ;;  %v303_v52 = vadd.f32 1.0, %v884_v47  ;;  %v245_v54 = vmul.f32 0.044715, %v229_v44  ;;  %v230_v55 = vmul.f32 %v214_v45, %v1153_v38  ;;  %v824_v57 = vpop.f32.mrb[12].mxu0  ;;  %897 = vtanh.f32 %v274_v46 }
  0xf2   :  { %v888_v58 = vpop.eup %887  ;;  %v263_v59 = vadd.f32 %v247_v48, %v1137_v24  ;;  %v248_v60 = vmul.f32 0.044715, %v232_v49  ;;  %v1168_v61 = vadd.f32 %v824_v57, %v1105_v33  ;;  %v174_v63 = vpop.f32.mrb[13].mxu0  ;;  %v301_v0 = vadd.f32 1.0, %v886_v51 }
  0xf3   :  { %v319_v1 = vmul.f32 %v303_v52, %v1111_v53  ;;  %v304_v56 = vadd.f32 1.0, %v888_v58  ;;  %v261_v3 = vadd.f32 %v245_v54, %v1140_v27  ;;  %v246_v4 = vmul.f32 0.044715, %v230_v55  ;;  %v825_v5 = vpop.f32.mrb[14].mxu0  ;;  %v890_v6 = vpop.eup %889 }
  0xf4   :  { %v279_v7 = vmul.f32 0.7978846, %v263_v59  ;;  %v264_v8 = vadd.f32 %v248_v60, %v1148_v35  ;;  %v219_v9 = vmul.f32 %v1168_v61, %v1168_v61  ;;  %v1176_v10 = vadd.f32 %v1105_v33, %v174_v63  ;;  %v177_v11 = vpop.f32.mrb[15].mxu0 }
  0xf5   :  { %v320_v12 = vmul.f32 %v304_v56, %v1128_v14  ;;  %v277_v13 = vmul.f32 0.7978846, %v261_v3  ;;  %v262_v53 = vadd.f32 %v246_v4, %v1153_v38  ;;  %v1181_v15 = vadd.f32 %v825_v5, %v1105_v33 }
  0xf6   :  { %899 = vtanh.f32 %v279_v7  ;;  %v280_v16 = vmul.f32 0.7978846, %v264_v8  ;;  %v235_v17 = vmul.f32 %v219_v9, %v1168_v61  ;;  %v217_v18 = vmul.f32 %v1176_v10, %v1176_v10 }
  0xf7   :  { %901 = vtanh.f32 %v277_v13  ;;  %v278_v19 = vmul.f32 0.7978846, %v262_v53  ;;  %v220_v22 = vmul.f32 %v1181_v15, %v1181_v15  ;;  %v1189_v14 = vadd.f32 %v1105_v33, %v177_v11 }
  0xf8   :  { %v892_v23 = vpop.eup %891  ;;  %903 = vtanh.f32 %v280_v16  ;;  %v251_v25 = vmul.f32 0.044715, %v235_v17  ;;  %v233_v26 = vmul.f32 %v217_v18, %v1176_v10  ;;  %v302_v28 = vadd.f32 1.0, %v890_v6 }
  0xf9   :  { %v894_v30 = vpop.eup %893  ;;  %905 = vtanh.f32 %v278_v19  ;;  %v236_v31 = vmul.f32 %v220_v22, %v1181_v15  ;;  %v218_v32 = vmul.f32 %v1189_v14, %v1189_v14  ;;  %v317_v34 = vmul.f32 %v301_v0, %v1117_v62 }
  0xfa   :  { %v896_v36 = vpop.eup %895  ;;  %v267_v37 = vadd.f32 %v251_v25, %v1168_v61  ;;  %v249_v33 = vmul.f32 0.044715, %v233_v26  ;;  %v318_v39 = vmul.f32 %v302_v28, %v1131_v20  ;;  %v334_v40 = vpack.c.bf16 %v320_v12, %v319_v1 }
  0xfb   :  { %v898_v41 = vpop.eup %897  ;;  %v252_v42 = vmul.f32 0.044715, %v236_v31  ;;  %v234_v43 = vmul.f32 %v218_v32, %v1189_v14  ;;  %v305_v44 = vadd.f32 1.0, %v894_v30  ;;  %v307_v45 = vadd.f32 1.0, %v892_v23 }
  0xfc   :  { %v283_v46 = vmul.f32 0.7978846, %v267_v37  ;;  %v265_v47 = vadd.f32 %v249_v33, %v1176_v10  ;;  %v333_v48 = vpack.c.bf16 %v318_v39, %v317_v34  ;;  %v306_v49 = vadd.f32 1.0, %v898_v41 }
  0xfd   :  { %v268_v62 = vadd.f32 %v252_v42, %v1181_v15  ;;  %v250_v51 = vmul.f32 0.044715, %v234_v43  ;;  %v196_v52 = vmul.f32 0.5, %v1122_v2  ;;  %v308_v54 = vadd.f32 1.0, %v896_v36 }
  0xfe   :  { %907 = vtanh.f32 %v283_v46  ;;  %v281_v20 = vmul.f32 0.7978846, %v265_v47  ;;  %842 = vmatprep.mubr.bf16.mxu0 %v333_v48  ;;  %v321_v55 = vmul.f32 %v305_v44, %v1133_v21  ;;  %v322_v57 = vmul.f32 %v306_v49, %v1142_v29 }
  0xff   :  { %v284_v58 = vmul.f32 0.7978846, %v268_v62  ;;  %v266_v59 = vadd.f32 %v250_v51, %v1189_v14  ;;  %843 = vmatmul.mubr.bf16.vlgmr.msra.gmra.mrb[16].mxu0 %v334_v40  ;;  %v323_v60 = vmul.f32 %v307_v45, %v1163_v50  ;;  %v324_v63 = vmul.f32 %v308_v54, %v196_v52 }
 0x100   :  { %v900_v0 = vpop.eup %899  ;;  %909 = vtanh.f32 %v281_v20  ;;  %v335_v1 = vpack.c.bf16 %v322_v57, %v321_v55  ;;  %v199_v29 = vmul.f32 0.5, %v1137_v24  ;;  %v200_v7 = vmul.f32 0.5, %v1148_v35 }
 0x101   :  { %v902_v56 = vpop.eup %901  ;;  %911 = vtanh.f32 %v284_v58  ;;  %v282_v2 = vmul.f32 0.7978846, %v266_v59  ;;  %v336_v3 = vpack.c.bf16 %v324_v63, %v323_v60  ;;  %v311_v4 = vadd.f32 1.0, %v900_v0 }
 0x102   :  { %v904_v5 = vpop.eup %903  ;;  %846 = vmatprep.mubr.bf16.mxu1 %v335_v1  ;;  %v309_v21 = vadd.f32 1.0, %v902_v56  ;;  %v197_v8 = vmul.f32 0.5, %v1140_v27  ;;  %v198_v9 = vmul.f32 0.5, %v1153_v38  ;;  %v203_v35 = vmul.f32 0.5, %v1168_v61  ;;  %v1217_v61 = vld [vmem:[%s1452_s4] ss:$0 sm:$0xff] }
 0x103   :  { %v906_v6 = vpop.eup %905  ;;  %913 = vtanh.f32 %v282_v2  ;;  %847 = vmatmul.mubr.bf16.vlgmr.msra.gmra.mrb[0].mxu1 %v336_v3  ;;  %v312_v50 = vadd.f32 1.0, %v904_v5  ;;  %v327_v12 = vmul.f32 %v311_v4, %v199_v29  ;;  %v204_v27 = vmul.f32 0.5, %v1181_v15 }
 0x104   :  { %v310_v11 = vadd.f32 1.0, %v906_v6  ;;  %v325_v53 = vmul.f32 %v309_v21, %v197_v8  ;;  %v201_v28 = vmul.f32 0.5, %v1176_v10  ;;  %v202_v30 = vmul.f32 0.5, %v1189_v14 }
 0x105   :  { %v328_v13 = vmul.f32 %v312_v50, %v200_v7 }
 0x106   :  { %v326_v16 = vmul.f32 %v310_v11, %v198_v9 }
 0x107   :  { %v338_v17 = vpack.c.bf16 %v328_v13, %v327_v12 }
 0x108   :  { %v908_v18 = vpop.eup %907  ;;  %v337_v19 = vpack.c.bf16 %v326_v16, %v325_v53 }
 0x109   :  { %v315_v23 = vadd.f32 1.0, %v908_v18 }
 0x10a   :  { %v910_v22 = vpop.eup %909  ;;  %850 = vmatprep.mubr.bf16.mxu1 %v337_v19 }
 0x10b   :  { %v912_v25 = vpop.eup %911  ;;  %851 = vmatmul.mubr.bf16.gmra.mrb[4].mxu1 %v338_v17  ;;  %v313_v24 = vadd.f32 1.0, %v910_v22  ;;  %v331_v32 = vmul.f32 %v315_v23, %v203_v35 }
 0x10c   :  { %v316_v26 = vadd.f32 1.0, %v912_v25 }
 0x10d   :  { %v914_v38 = vpop.eup %913  ;;  %v329_v36 = vmul.f32 %v313_v24, %v201_v28 }
 0x10e   :  { %v314_v31 = vadd.f32 1.0, %v914_v38  ;;  %v332_v34 = vmul.f32 %v316_v26, %v204_v27 }
 0x110   :  { %v330_v37 = vmul.f32 %v314_v31, %v202_v30  ;;  %v340_v33 = vpack.c.bf16 %v332_v34, %v331_v32 }
 0x112   :  { %v339_v39 = vpack.c.bf16 %v330_v37, %v329_v36 }
 0x114   :  { %854 = vmatprep.mubr.bf16.mxu1 %v339_v39 }
 0x115   :  { %855 = vmatmul.mubr.bf16.gmra.mrb[8].mxu1 %v340_v33 }
 0x1d2   :  { %v844_v15 = vpop.f32.mrb[16].mxu0 }
 0x1d3   :  { %v455_v40 = vadd.f32 %v844_v15, %v1217_v61  ;;  %v446_v10 = vpop.f32.mrb[17].mxu0 }
 0x1d4   :  { %v447_v14 = vadd.f32 %v1217_v61, %v446_v10  ;;  %v845_v41 = vpop.f32.mrb[18].mxu0 }
 0x1d5   :  { %v527_v42 = vmul.f32 %v455_v40, %v455_v40  ;;  %v1222_v43 = vadd.f32 %v845_v41, %v1217_v61  ;;  %v449_v44 = vpop.f32.mrb[19].mxu0  ;;  %v1259_v17 = vmul.f32 0.5, %v455_v40 }
 0x1d6   :  { %v525_v45 = vmul.f32 %v447_v14, %v447_v14  ;;  %v1225_v46 = vadd.f32 %v1217_v61, %v449_v44  ;;  %v848_v47 = vpop.f32.mrb[0].mxu1  ;;  %v509_v37 = vmul.f32 0.5, %v447_v14 }
 0x1d7   :  { %v543_v48 = vmul.f32 %v527_v42, %v455_v40  ;;  %v528_v49 = vmul.f32 %v1222_v43, %v1222_v43  ;;  %v1230_v62 = vadd.f32 %v848_v47, %v1217_v61  ;;  %v462_v51 = vpop.f32.mrb[1].mxu1 }
 0x1d8   :  { %v541_v52 = vmul.f32 %v525_v45, %v447_v14  ;;  %v526_v54 = vmul.f32 %v1225_v46, %v1225_v46  ;;  %v1235_v20 = vadd.f32 %v1217_v61, %v462_v51  ;;  %v849_v55 = vpop.f32.mrb[2].mxu1  ;;  %v510_v51 = vmul.f32 0.5, %v1225_v46 }
 0x1d9   :  { %v559_v57 = vmul.f32 0.044715, %v543_v48  ;;  %v544_v58 = vmul.f32 %v528_v49, %v1222_v43  ;;  %v531_v59 = vmul.f32 %v1230_v62, %v1230_v62  ;;  %v1241_v60 = vadd.f32 %v849_v55, %v1217_v61  ;;  %v465_v63 = vpop.f32.mrb[3].mxu1 }
 0x1da   :  { %v557_v0 = vmul.f32 0.044715, %v541_v52  ;;  %v542_v1 = vmul.f32 %v526_v54, %v1225_v46  ;;  %v529_v56 = vmul.f32 %v1235_v20, %v1235_v20  ;;  %v1247_v2 = vadd.f32 %v1217_v61, %v465_v63 }
 0x1db   :  { %v560_v3 = vmul.f32 0.044715, %v544_v58  ;;  %v547_v4 = vmul.f32 %v531_v59, %v1230_v62  ;;  %v532_v5 = vmul.f32 %v1241_v60, %v1241_v60  ;;  %v575_v21 = vadd.f32 %v559_v57, %v455_v40 }
 0x1dc   :  { %v558_v6 = vmul.f32 0.044715, %v542_v1  ;;  %v545_v29 = vmul.f32 %v529_v56, %v1235_v20  ;;  %v530_v7 = vmul.f32 %v1247_v2, %v1247_v2  ;;  %v573_v50 = vadd.f32 %v557_v0, %v447_v14 }
 0x1dd   :  { %v576_v8 = vadd.f32 %v560_v3, %v1222_v43  ;;  %v563_v9 = vmul.f32 0.044715, %v547_v4  ;;  %v548_v11 = vmul.f32 %v532_v5, %v1241_v60  ;;  %v591_v12 = vmul.f32 0.7978846, %v575_v21 }
 0x1de   :  { %v574_v13 = vadd.f32 %v558_v6, %v1225_v46  ;;  %v546_v53 = vmul.f32 %v530_v7, %v1247_v2  ;;  %v852_v16 = vpop.f32.mrb[4].mxu1  ;;  %v589_v18 = vmul.f32 0.7978846, %v573_v50  ;;  %v561_v19 = vmul.f32 0.044715, %v545_v29 }
 0x1df   :  { %v564_v22 = vmul.f32 0.044715, %v548_v11  ;;  %v1262_v23 = vadd.f32 %v852_v16, %v1217_v61  ;;  %v478_v25 = vpop.f32.mrb[5].mxu1  ;;  %915 = vtanh.f32 %v591_v12  ;;  %v579_v24 = vadd.f32 %v563_v9, %v1230_v62 }
 0x1e0   :  { %v562_v35 = vmul.f32 0.044715, %v546_v53  ;;  %v1266_v27 = vadd.f32 %v1217_v61, %v478_v25  ;;  %v853_v26 = vpop.f32.mrb[6].mxu1  ;;  %917 = vtanh.f32 %v589_v18  ;;  %v592_v32 = vmul.f32 0.7978846, %v576_v8 }
 0x1e1   :  { %v580_v38 = vadd.f32 %v564_v22, %v1241_v60  ;;  %v535_v28 = vmul.f32 %v1262_v23, %v1262_v23  ;;  %v1272_v30 = vadd.f32 %v853_v26, %v1217_v61  ;;  %v481_v31 = vpop.f32.mrb[7].mxu1  ;;  %v590_v33 = vmul.f32 0.7978846, %v574_v13 }
 0x1e2   :  { %v533_v34 = vmul.f32 %v1266_v27, %v1266_v27  ;;  %v1277_v36 = vadd.f32 %v1217_v61, %v481_v31  ;;  %v577_v39 = vadd.f32 %v561_v19, %v1235_v20  ;;  %919 = vtanh.f32 %v592_v32 }
 0x1e3   :  { %v551_v15 = vmul.f32 %v535_v28, %v1262_v23  ;;  %v536_v40 = vmul.f32 %v1272_v30, %v1272_v30  ;;  %v578_v10 = vadd.f32 %v562_v35, %v1247_v2  ;;  %921 = vtanh.f32 %v590_v33 }
 0x1e4   :  { %v534_v41 = vmul.f32 %v1277_v36, %v1277_v36  ;;  %v595_v42 = vmul.f32 0.7978846, %v579_v24  ;;  %v549_v45 = vmul.f32 %v533_v34, %v1266_v27  ;;  %v596_v47 = vmul.f32 0.7978846, %v580_v38 }
 0x1e5   :  { %v567_v44 = vmul.f32 0.044715, %v551_v15  ;;  %v552_v14 = vmul.f32 %v536_v40, %v1272_v30  ;;  %v512_v49 = vmul.f32 0.5, %v1222_v43  ;;  %v1293_v54 = vmul.f32 0.5, %v1230_v62 }
 0x1e6   :  { %v550_v48 = vmul.f32 %v534_v41, %v1277_v36  ;;  %923 = vtanh.f32 %v595_v42  ;;  %v593_v55 = vmul.f32 0.7978846, %v577_v39  ;;  %v516_v59 = vmul.f32 0.5, %v1241_v60 }
 0x1e7   :  { %v583_v52 = vadd.f32 %v567_v44, %v1262_v23  ;;  %925 = vtanh.f32 %v596_v47  ;;  %v568_v57 = vmul.f32 0.044715, %v552_v14  ;;  %v594_v63 = vmul.f32 0.7978846, %v578_v10 }
 0x1e8   :  { %v856_v58 = vpop.f32.mrb[8].mxu1  ;;  %v565_v1 = vmul.f32 0.044715, %v549_v45  ;;  %v1300_v46 = vmul.f32 0.5, %v1235_v20  ;;  %927 = vtanh.f32 %v593_v55  ;;  %v566_v62 = vmul.f32 0.044715, %v550_v48 }
 0x1e9   :  { %v916_v0 = vpop.eup %915  ;;  %v1297_v56 = vadd.f32 %v856_v58, %v1217_v61  ;;  %v494_v43 = vpop.f32.mrb[9].mxu1  ;;  %929 = vtanh.f32 %v594_v63  ;;  %v1313_v20 = vld [vmem:[%s1453_s5] ss:$0 sm:$0xff]  ;;  %v599_v50 = vmul.f32 0.7978846, %v583_v52  ;;  %v584_v8 = vadd.f32 %v568_v57, %v1272_v30 }
 0x1ea   :  { %v918_v3 = vpop.eup %917  ;;  %v1303_v4 = vadd.f32 %v1217_v61, %v494_v43  ;;  %v857_v5 = vpop.f32.mrb[10].mxu1  ;;  %v623_v21 = vadd.f32 1.0, %v916_v0  ;;  %v581_v35 = vadd.f32 %v565_v1, %v1266_v27  ;;  %v582_v39 = vadd.f32 %v566_v62, %v1277_v36 }
 0x1eb   :  { %v539_v60 = vmul.f32 %v1297_v56, %v1297_v56  ;;  %v1308_v6 = vadd.f32 %v857_v5, %v1217_v61  ;;  %v497_v29 = vpop.f32.mrb[11].mxu1  ;;  %v621_v7 = vadd.f32 1.0, %v918_v3  ;;  %931 = vtanh.f32 %v599_v50 }
 0x1ec   :  { %v537_v9 = vmul.f32 %v1303_v4, %v1303_v4  ;;  %v1319_v11 = vadd.f32 %v1217_v61, %v497_v29  ;;  %v639_v12 = vmul.f32 %v623_v21, %v1259_v17  ;;  %v920_v13 = vpop.eup %919  ;;  %v514_v58 = vmul.f32 0.5, %v1247_v2 }
 0x1ed   :  { %v555_v53 = vmul.f32 %v539_v60, %v1297_v56  ;;  %v540_v16 = vmul.f32 %v1308_v6, %v1308_v6  ;;  %v637_v18 = vmul.f32 %v621_v7, %v509_v37  ;;  %v922_v19 = vpop.eup %921  ;;  %v624_v61 = vadd.f32 1.0, %v920_v13 }
 0x1ee   :  { %v553_v22 = vmul.f32 %v537_v9, %v1303_v4  ;;  %v538_v25 = vmul.f32 %v1319_v11, %v1319_v11  ;;  %v662_v24 = vmul.f32 %v1313_v20, %v639_v12  ;;  %v622_v38 = vadd.f32 1.0, %v922_v19 }
 0x1ef   :  { %v556_v17 = vmul.f32 %v540_v16, %v1308_v6  ;;  %v660_v26 = vmul.f32 %v1313_v20, %v637_v18  ;;  %v640_v34 = vmul.f32 %v624_v61, %v512_v49  ;;  %v600_v37 = vmul.f32 0.7978846, %v584_v8 }
 0x1f0   :  { %v924_v28 = vpop.eup %923  ;;  %v569_v31 = vmul.f32 0.044715, %v553_v22  ;;  %v554_v32 = vmul.f32 %v538_v25, %v1319_v11  ;;  %680 = vadd.xlane.f32.xlu1 %v662_v24  ;;  %v571_v15 = vmul.f32 0.044715, %v555_v53  ;;  %v638_v40 = vmul.f32 %v622_v38, %v510_v51 }
 0x1f1   :  { %v926_v33 = vpop.eup %925  ;;  %676 = vadd.xlane.f32.xlu0 %v660_v26  ;;  %v627_v10 = vadd.f32 1.0, %v924_v28  ;;  %v572_v41 = vmul.f32 0.044715, %v556_v17  ;;  %v663_v44 = vmul.f32 %v1313_v20, %v640_v34  ;;  %933 = vtanh.f32 %v600_v37 }
 0x1f2   :  { %v570_v42 = vmul.f32 0.044715, %v554_v32  ;;  %v628_v45 = vadd.f32 1.0, %v926_v33  ;;  %v928_v14 = vpop.eup %927  ;;  %v585_v47 = vadd.f32 %v569_v31, %v1303_v4  ;;  %v661_v48 = vmul.f32 %v1313_v20, %v638_v40 }
 0x1f3   :  { %v643_v49 = vmul.f32 %v627_v10, %v1293_v54  ;;  %v930_v52 = vpop.eup %929  ;;  %v625_v51 = vadd.f32 1.0, %v928_v14  ;;  %v587_v63 = vadd.f32 %v571_v15, %v1297_v56  ;;  %v597_v43 = vmul.f32 0.7978846, %v581_v35 }
 0x1f4   :  { %v586_v55 = vadd.f32 %v570_v42, %v1319_v11  ;;  %682 = vadd.xlane.f32.xlu1 %v663_v44  ;;  %v644_v57 = vmul.f32 %v628_v45, %v516_v59  ;;  %v626_v1 = vadd.f32 1.0, %v930_v52  ;;  %v588_v3 = vadd.f32 %v572_v41, %v1308_v6 }
 0x1f5   :  { %678 = vadd.xlane.f32.xlu0 %v661_v48  ;;  %v666_v0 = vmul.f32 %v1313_v20, %v643_v49  ;;  %v598_v62 = vmul.f32 0.7978846, %v582_v39  ;;  %v932_v5 = vpop.eup %931  ;;  %v641_v21 = vmul.f32 %v625_v51, %v1300_v46  ;;  %935 = vtanh.f32 %v597_v43 }
 0x1f6   :  { %v667_v54 = vmul.f32 %v1313_v20, %v644_v57  ;;  %v642_v60 = vmul.f32 %v626_v1, %v514_v58  ;;  %v601_v59 = vmul.f32 0.7978846, %v585_v47  ;;  %v519_v2 = vmul.f32 0.5, %v1262_v23 }
 0x1f7   :  { %v631_v29 = vadd.f32 1.0, %v932_v5  ;;  %937 = vtanh.f32 %v598_v62  ;;  %v602_v7 = vmul.f32 0.7978846, %v586_v55  ;;  %v603_v50 = vmul.f32 0.7978846, %v587_v63 }
 0x1f8   :  { %690 = vadd.xlane.f32.xlu1 %v667_v54  ;;  %939 = vtanh.f32 %v601_v59  ;;  %v665_v8 = vmul.f32 %v1313_v20, %v642_v60  ;;  %v604_v12 = vmul.f32 0.7978846, %v588_v3  ;;  %v664_v13 = vmul.f32 %v1313_v20, %v641_v21 }
 0x1f9   :  { %688 = vadd.xlane.f32.xlu0 %v666_v0  ;;  %v647_v9 = vmul.f32 %v631_v29, %v519_v2  ;;  %941 = vtanh.f32 %v602_v7  ;;  %v520_v53 = vmul.f32 0.5, %v1272_v30  ;;  %v517_v24 = vmul.f32 0.5, %v1266_v27 }
 0x1fa   :  { %943 = vtanh.f32 %v603_v50  ;;  %v518_v17 = vmul.f32 0.5, %v1277_v36  ;;  %v521_v31 = vmul.f32 0.5, %v1303_v4  ;;  %v522_v37 = vmul.f32 0.5, %v1319_v11 }
 0x1fb   :  { %945 = vtanh.f32 %v604_v12  ;;  %v934_v46 = vpop.eup %933  ;;  %v670_v23 = vmul.f32 %v1313_v20, %v647_v9  ;;  %v523_v4 = vmul.f32 0.5, %v1297_v56  ;;  %v524_v11 = vmul.f32 0.5, %v1308_v6 }
 0x1fc   :  { %686 = vadd.xlane.f32.xlu1 %v665_v8  ;;  %v632_v16 = vadd.f32 1.0, %v934_v46  ;;  %v1366_v49 = vstv %s1454_s6 }
 0x1fd   :  { %684 = vadd.xlane.f32.xlu0 %v664_v13 }
 0x1fe   :  { %v648_v18 = vmul.f32 %v632_v16, %v520_v53 }
 0x1ff   :  { %v936_v19 = vpop.eup %935 }
 0x200   :  { %v671_v25 = vmul.f32 %v1313_v20, %v648_v18  ;;  %v629_v61 = vadd.f32 1.0, %v936_v19 }
 0x201   :  { %696 = vadd.xlane.f32.xlu0 %v670_v23  ;;  %v938_v22 = vpop.eup %937 }
 0x202   :  { %v940_v35 = vpop.eup %939  ;;  %v630_v26 = vadd.f32 1.0, %v938_v22  ;;  %698 = vadd.xlane.f32.xlu1 %v671_v25  ;;  %v645_v28 = vmul.f32 %v629_v61, %v517_v24 }
 0x203   :  { %v942_v38 = vpop.eup %941  ;;  %v633_v30 = vadd.f32 1.0, %v940_v35 }
 0x204   :  { %v944_v32 = vpop.eup %943  ;;  %v646_v34 = vmul.f32 %v630_v26, %v518_v17  ;;  %v634_v33 = vadd.f32 1.0, %v942_v38  ;;  %v668_v15 = vmul.f32 %v1313_v20, %v645_v28 }
 0x205   :  { %v946_v39 = vpop.eup %945  ;;  %v649_v27 = vmul.f32 %v633_v30, %v521_v31  ;;  %v635_v40 = vadd.f32 1.0, %v944_v32 }
 0x206   :  { %v669_v10 = vmul.f32 %v1313_v20, %v646_v34  ;;  %v650_v36 = vmul.f32 %v634_v33, %v522_v37  ;;  %v636_v41 = vadd.f32 1.0, %v946_v39  ;;  %692 = vadd.xlane.f32.xlu0 %v668_v15 }
 0x207   :  { %v672_v42 = vmul.f32 %v1313_v20, %v649_v27  ;;  %v651_v45 = vmul.f32 %v635_v40, %v523_v4 }
 0x208   :  { %694 = vadd.xlane.f32.xlu1 %v669_v10  ;;  %v673_v44 = vmul.f32 %v1313_v20, %v650_v36  ;;  %v652_v14 = vmul.f32 %v636_v41, %v524_v11 }
 0x209   :  { %v674_v47 = vmul.f32 %v1313_v20, %v651_v45 }
 0x20a   :  { %700 = vadd.xlane.f32.xlu0 %v672_v42  ;;  %v675_v48 = vmul.f32 %v1313_v20, %v652_v14 }
 0x20c   :  { %702 = vadd.xlane.f32.xlu1 %v673_v44 }
 0x20e   :  { %704 = vadd.xlane.f32.xlu0 %v674_v47 }
 0x210   :  { %706 = vadd.xlane.f32.xlu1 %v675_v48 }
 0x27d   :  { %v681_v56 = vpop.xlane.xlu1 %680 }
 0x27e   :  { %v712_v52 = vadd.f32 %v1366_v49, %v681_v56  ;;  %v677_v55 = vpop.xlane.xlu0 %676 }
 0x27f   :  { %v710_v6 = vadd.f32 %v1366_v49, %v677_v55 }
 0x280   :  { %947 = vtanh.f32 %v712_v52 }
 0x281   :  { %949 = vtanh.f32 %v710_v6  ;;  %v683_v57 = vpop.xlane.xlu1 %682 }
 0x282   :  { %v713_v51 = vadd.f32 %v1366_v49, %v683_v57  ;;  %v679_v58 = vpop.xlane.xlu0 %678 }
 0x283   :  { %v711_v20 = vadd.f32 %v1366_v49, %v679_v58 }
 0x284   :  { %951 = vtanh.f32 %v713_v51 }
 0x285   :  { %953 = vtanh.f32 %v711_v20  ;;  %v691_v63 = vpop.xlane.xlu1 %690 }
 0x286   :  { %v689_v0 = vpop.xlane.xlu0 %688  ;;  %v717_v1 = vadd.f32 %v1366_v49, %v691_v63 }
 0x287   :  { %v716_v43 = vadd.f32 %v1366_v49, %v689_v0 }
 0x288   :  { %955 = vtanh.f32 %v717_v1 }
 0x289   :  { %957 = vtanh.f32 %v716_v43  ;;  %v687_v3 = vpop.xlane.xlu1 %686 }
 0x28a   :  { %v948_v54 = vpop.eup %947  ;;  %v685_v62 = vpop.xlane.xlu0 %684  ;;  %v715_v5 = vadd.f32 %v1366_v49, %v687_v3 }
 0x28b   :  { %v950_v21 = vpop.eup %949  ;;  %745 = vst.msk [vmem:[%s1455_s7 + $0x10] sm:$0xff] %vm742_vm1, %v948_v54  ;;  %v714_v60 = vadd.f32 %v1366_v49, %v685_v62 }
 0x28c   :  { %743 = vst.msk [vmem:[%s1455_s7] sm:$0xff] %vm742_vm1, %v950_v21  ;;  %959 = vtanh.f32 %v715_v5 }
 0x28d   :  { %961 = vtanh.f32 %v714_v60 }
 0x28e   :  { %v952_v59 = vpop.eup %951  ;;  %v697_v2 = vpop.xlane.xlu0 %696 }
 0x28f   :  { %v954_v29 = vpop.eup %953  ;;  %746 = vst.msk [vmem:[%s1455_s7 + $0x18] sm:$0xff] %vm742_vm1, %v952_v59  ;;  %v720_v7 = vadd.f32 %v1366_v49, %v697_v2  ;;  %v699_v50 = vpop.xlane.xlu1 %698 }
 0x290   :  { %744 = vst.msk [vmem:[%s1455_s7 + $0x8] sm:$0xff] %vm742_vm1, %v954_v29  ;;  %v721_v9 = vadd.f32 %v1366_v49, %v699_v50 }
 0x291   :  { %963 = vtanh.f32 %v720_v7 }
 0x292   :  { %v956_v8 = vpop.eup %955  ;;  %965 = vtanh.f32 %v721_v9 }
 0x293   :  { %v958_v12 = vpop.eup %957  ;;  %750 = vst.msk [vmem:[%s1455_s7 + $0x38] sm:$0xff] %vm742_vm1, %v956_v8  ;;  %v693_v13 = vpop.xlane.xlu0 %692 }
 0x294   :  { %749 = vst.msk [vmem:[%s1455_s7 + $0x30] sm:$0xff] %vm742_vm1, %v958_v12  ;;  %v718_v23 = vadd.f32 %v1366_v49, %v693_v13 }
 0x295   :  { %v695_v53 = vpop.xlane.xlu1 %694 }
 0x296   :  { %v960_v46 = vpop.eup %959  ;;  %v719_v18 = vadd.f32 %v1366_v49, %v695_v53  ;;  %967 = vtanh.f32 %v718_v23 }
 0x297   :  { %v962_v16 = vpop.eup %961  ;;  %748 = vst.msk [vmem:[%s1455_s7 + $0x28] sm:$0xff] %vm742_vm1, %v960_v46  ;;  %v701_v19 = vpop.xlane.xlu0 %700 }
 0x298   :  { %747 = vst.msk [vmem:[%s1455_s7 + $0x20] sm:$0xff] %vm742_vm1, %v962_v16  ;;  %969 = vtanh.f32 %v719_v18  ;;  %v722_v22 = vadd.f32 %v1366_v49, %v701_v19 }
 0x299   :  { %v703_v25 = vpop.xlane.xlu1 %702 }
 0x29a   :  { %v723_v61 = vadd.f32 %v1366_v49, %v703_v25  ;;  %971 = vtanh.f32 %v722_v22 }
 0x29b   :  { %v964_v24 = vpop.eup %963  ;;  %v705_v35 = vpop.xlane.xlu0 %704 }
 0x29c   :  { %753 = vst.msk [vmem:[%s1455_s7 + $0x50] sm:$0xff] %vm742_vm1, %v964_v24  ;;  %973 = vtanh.f32 %v723_v61  ;;  %v966_v17 = vpop.eup %965  ;;  %v724_v26 = vadd.f32 %v1366_v49, %v705_v35 }
 0x29d   :  { %v707_v38 = vpop.xlane.xlu1 %706  ;;  %754 = vst.msk [vmem:[%s1455_s7 + $0x58] sm:$0xff] %vm742_vm1, %v966_v17 }
 0x29e   :  { %v725_v28 = vadd.f32 %v1366_v49, %v707_v38  ;;  %975 = vtanh.f32 %v724_v26 }
 0x2a0   :  { %977 = vtanh.f32 %v725_v28  ;;  %v968_v31 = vpop.eup %967 }
 0x2a1   :  { %751 = vst.msk [vmem:[%s1455_s7 + $0x40] sm:$0xff] %vm742_vm1, %v968_v31 }
 0x2a2   :  { %v970_v30 = vpop.eup %969 }
 0x2a3   :  { %752 = vst.msk [vmem:[%s1455_s7 + $0x48] sm:$0xff] %vm742_vm1, %v970_v30 }
 0x2a4   :  { %v972_v32 = vpop.eup %971 }
 0x2a5   :  { %755 = vst.msk [vmem:[%s1455_s7 + $0x60] sm:$0xff] %vm742_vm1, %v972_v32 }
 0x2a6   :  { %v974_v34 = vpop.eup %973 }
 0x2a7   :  { %756 = vst.msk [vmem:[%s1455_s7 + $0x68] sm:$0xff] %vm742_vm1, %v974_v34 }
 0x2a8   :  { %v976_v37 = vpop.eup %975 }
 0x2a9   :  { %757 = vst.msk [vmem:[%s1455_s7 + $0x70] sm:$0xff] %vm742_vm1, %v976_v37 }
 0x2aa   :  { %v978_v33 = vpop.eup %977 }
 0x2ab   :  { %758 = vst.msk [vmem:[%s1455_s7 + $0x78] sm:$0xff] %vm742_vm1, %v978_v33 }

</bundles_post_ra>
